<compile_context>
chip_gen: v6e
topology: v6e:2x2x1
jax: 0.10.0
libtpu: 0.0.40
codegen_flags: <defaults>
</compile_context>

<pallas_src>
import jax
import jax.numpy as jnp
from jax import lax
from jax.experimental import pallas as pl
from jax.experimental.pallas import tpu as pltpu


def _round_up(x: int, m: int) -> int:
    return ((x + m - 1) // m) * m


def _pick_chunk(T: int) -> int:
    # Multiple of 8 sublanes; capped at 64 so exp(-cum_log_gate) stays well
    # inside the f32 exponent range for this decomposition.
    return min(64, _round_up(T, 8))


def _pick_batch_tile(B: int, C: int) -> int:
    # Largest divisor of B such that (a) the batch grid axis keeps >= 2 steps
    # (both v7x TensorCores get work) and (b) Bt*C <= 512 rows to bound VMEM
    # and vreg pressure while still filling the MXU M-dim when possible.
    best = 1
    for d in range(1, B + 1):
        if B % d == 0 and d * C <= 512 and (B // d >= 2 or B <= 1):
            best = d
    return best


@jax.jit
def base_rnn_forward(hidden_state, wq, wk, wv, wg, wo):
    B, T, H = hidden_state.shape
    K = wq.shape[1]
    V = wv.shape[1]
    O = wo.shape[1]
    dtype = hidden_state.dtype

    # Lane-pad projection output dims to multiples of 128 so every q/k/v/g
    # segment of the fused weight starts on a 128-lane boundary and every
    # output / state store is a full-lane (unmasked) store.
    Kp = _round_up(K, 128)
    Vp = _round_up(V, 128)
    Op = _round_up(O, 128)

    C = _pick_chunk(T)
    T_pad = _round_up(T, C)
    Bt = _pick_batch_tile(B, C)
    nb = B // Bt
    nc = T_pad // C

    def _pad_cols(w, n):
        return jnp.pad(w, ((0, 0), (0, n - w.shape[1])))

    # Fused QKVG weight (H, 3*Kp + Vp); bf16 MXU operands, f32 accumulation.
    w_qkvg = jnp.concatenate(
        [_pad_cols(wq, Kp), _pad_cols(wk, Kp), _pad_cols(wv, Vp),
         _pad_cols(wg, Kp)], axis=1).astype(jnp.bfloat16)
    wo_p = jnp.pad(wo, ((0, Vp - V), (0, Op - O))).astype(jnp.bfloat16)

    h = hidden_state
    if T_pad != T:
        h = jnp.pad(h, ((0, 0), (0, T_pad - T), (0, 0)))
    h = h.astype(jnp.bfloat16)

    def kernel(h_ref, wqkvg_ref, wo_ref, out_ref, state_ref):
        c = pl.program_id(1)

        # state_ref's block index is constant along the chunk axis, so it is
        # VMEM-resident across chunks and doubles as the carried RNN state.
        @pl.when(c == 0)
        def _():
            state_ref[...] = jnp.zeros_like(state_ref)

        # ---- fused QKVG projection: one bf16 MXU matmul, f32 accumulation --
        h2 = h_ref[...].reshape(Bt * C, H)
        proj = jnp.dot(h2, wqkvg_ref[...], preferred_element_type=jnp.float32)
        q = proj[:, 0 * Kp:1 * Kp].reshape(Bt, C, Kp)
        k = proj[:, 1 * Kp:2 * Kp].reshape(Bt, C, Kp)
        v = proj[:, 2 * Kp:2 * Kp + Vp].reshape(Bt, C, Vp)
        glogit = proj[:, 2 * Kp + Vp:]

        # Stable log-sigmoid in f32 (avoids log(sigmoid(x)) = -inf).
        logg = jnp.minimum(glogit, 0.0) - jnp.log(
            1.0 + jnp.exp(-jnp.abs(glogit)))
        logg = logg.reshape(Bt, C, Kp)

        # Padded key lanes / padded tail timesteps are forced to gate == 1
        # (log-gate 0) so they are exact no-ops for the recurrence.
        if Kp != K or T_pad != T:
            t_idx = lax.broadcasted_iota(jnp.int32, (C, Kp), 0) + c * C
            lane = lax.broadcasted_iota(jnp.int32, (C, Kp), 1)
            valid = (t_idx < T) & (lane < K)
            logg = jnp.where(valid[None, :, :], logg, 0.0)

        # ---- inclusive cumulative log-gate via a tril matmul (f32, exact) --
        row = lax.broadcasted_iota(jnp.int32, (C, C), 0)
        col = lax.broadcasted_iota(jnp.int32, (C, C), 1)
        causal = col <= row
        tril = jnp.broadcast_to(causal.astype(jnp.float32), (Bt, C, C))
        L = jnp.einsum('bts,bsi->bti', tril, logg,
                       preferred_element_type=jnp.float32)

        a = jnp.exp(L)                                  # in (0, 1]
        l_last = L[:, C - 1, :]                         # (Bt, Kp)
        a_last = jnp.exp(l_last)
        qa = (q * a).astype(jnp.bfloat16)               # q~_t = q_t * A_t
        kb = (k * jnp.exp(-L)).astype(jnp.bfloat16)     # k~_s = k_s / A_s
        # Decay-to-chunk-end factors are bounded (<= 1): numerically safe.
        kd = (k * jnp.exp(l_last[:, None, :] - L)).astype(jnp.bfloat16)
        v_b = v.astype(jnp.bfloat16)

        s0 = state_ref[...]                             # (Bt, Kp, Vp) f32

        # ---- outputs: intra-chunk masked scores + inter-chunk q~ @ S_start -
        scores = jnp.einsum('bti,bsi->bts', qa, kb,
                            preferred_element_type=jnp.float32)
        scores = jnp.where(causal[None, :, :], scores, 0.0)
        o = jnp.einsum('bts,bsv->btv', scores.astype(jnp.bfloat16), v_b,
                       preferred_element_type=jnp.float32)
        o = o + jnp.einsum('bti,biv->btv', qa, s0.astype(jnp.bfloat16),
                           preferred_element_type=jnp.float32)

        # One Wo projection per chunk + one lane-dense block store.
        out2 = jnp.dot(o.reshape(Bt * C, Vp).astype(jnp.bfloat16), wo_ref[...],
                       preferred_element_type=jnp.float32)
        out_ref[...] = out2.reshape(Bt, C, Op).astype(out_ref.dtype)

        # ---- state hand-off: S_end = A_last * S_start + sum_s kd_s v_s^T ---
        ktv = jnp.einsum('bsi,bsv->biv', kd, v_b,
                         preferred_element_type=jnp.float32)
        state_ref[...] = a_last[:, :, None] * s0 + ktv

    grid_spec = pltpu.PrefetchScalarGridSpec(
        num_scalar_prefetch=0,
        grid=(nb, nc),
        in_specs=[
            pl.BlockSpec((Bt, C, H), lambda b, c: (b, c, 0)),        # hidden
            pl.BlockSpec((H, 3 * Kp + Vp), lambda b, c: (0, 0)),     # Wqkvg
            pl.BlockSpec((Vp, Op), lambda b, c: (0, 0)),             # Wo
        ],
        out_specs=[
            pl.BlockSpec((Bt, C, Op), lambda b, c: (b, c, 0)),       # output
            pl.BlockSpec((Bt, Kp, Vp), lambda b, c: (b, 0, 0)),      # state
        ],
    )

    out_shape = (
        jax.ShapeDtypeStruct((B, T_pad, Op), jnp.float32),
        jax.ShapeDtypeStruct((B, Kp, Vp), jnp.float32),
    )

    # Advisory cost estimate so XLA schedules surrounding ops sensibly.
    flops = (2 * B * T_pad * H * (3 * Kp + Vp)      # qkvg projection
             + 2 * B * T_pad * C * Kp               # cumulative-gate matmul
             + 2 * B * T_pad * C * Kp               # intra-chunk scores
             + 2 * B * T_pad * C * Vp               # intra-chunk output
             + 4 * B * T_pad * Kp * Vp              # inter-chunk out + state
             + 2 * B * T_pad * Vp * Op)             # Wo projection
    transcendentals = 6 * B * T_pad * Kp
    bytes_accessed = (h.size * 2 + w_qkvg.size * 2 + wo_p.size * 2
                      + B * T_pad * Op * 4 + B * Kp * Vp * 4)

    # VMEM budget: double-buffered blocks plus headroom for f32 intermediates,
    # clamped to v7x's 64 MiB physical VMEM.
    block_bytes = (2 * Bt * C * H * 2 + 2 * H * (3 * Kp + Vp) * 2
                   + 2 * Vp * Op * 2 + 2 * Bt * C * Op * 4
                   + 2 * Bt * Kp * Vp * 4)
    vmem_limit = min(64 * 1024 * 1024, max(32 * 1024 * 1024, 8 * block_bytes))

    out_full, state_full = pl.pallas_call(
        kernel,
        out_shape=out_shape,
        grid_spec=grid_spec,
        compiler_params=pltpu.CompilerParams(
            dimension_semantics=("parallel", "arbitrary"),
            vmem_limit_bytes=vmem_limit),
        cost_estimate=pl.CostEstimate(
            flops=flops, transcendentals=transcendentals,
            bytes_accessed=bytes_accessed),
    )(h, w_qkvg, wo_p)

    output = out_full[:, :T, :O].astype(dtype)
    final_state = state_full[:, :K, :V].astype(dtype)
    return output, final_state


# ---------------------------------------------------------------------------
# Pure-JAX sequential reference (for correctness check)
# ---------------------------------------------------------------------------
def base_rnn_reference(hidden_state, wq, wk, wv, wg, wo):
    q = hidden_state @ wq
    k = hidden_state @ wk
    v = hidden_state @ wv
    g = jax.nn.sigmoid(hidden_state @ wg)
    K, V = wq.shape[1], wv.shape[1]

    def one_batch(qb, kb, vb, gb):
        def step(S, inp):
            qt, kt, vt, gt = inp
            S = gt[:, None] * S + kt[:, None] * vt[None, :]
            return S, (qt @ S) @ wo
        S0 = jnp.zeros((K, V), jnp.float32)
        S_final, outs = lax.scan(step, S0, (qb, kb, vb, gb))
        return outs, S_final

    outs, states = jax.vmap(one_batch)(q, k, v, g)
    return outs, states


# ---------------------------------------------------------------------------
# Main
# ---------------------------------------------------------------------------
if __name__ == "__main__":
    B, T = 2, 8
    hidden_dim, key_dim, value_dim, output_dim = 32, 16, 16, 32

    root = jax.random.PRNGKey(0)
    kx, kq, kk, kv, kg, ko = jax.random.split(root, 6)

    hidden_state = jax.random.normal(kx, (B, T, hidden_dim), dtype=jnp.float32)
    wq = 0.1 * jax.random.normal(kq, (hidden_dim, key_dim), dtype=jnp.float32)
    wk = 0.1 * jax.random.normal(kk, (hidden_dim, key_dim), dtype=jnp.float32)
    wv = 0.1 * jax.random.normal(kv, (hidden_dim, value_dim), dtype=jnp.float32)
    wg = 0.1 * jax.random.normal(kg, (hidden_dim, key_dim), dtype=jnp.float32)
    wo = 0.1 * jax.random.normal(ko, (value_dim, output_dim), dtype=jnp.float32)

    out, state = base_rnn_forward(hidden_state, wq, wk, wv, wg, wo)
    out, state = jax.block_until_ready((out, state))

    ref_out, ref_state = base_rnn_reference(hidden_state, wq, wk, wv, wg, wo)

    assert out.shape == (B, T, output_dim)
    assert state.shape == (B, key_dim, value_dim)
    # bf16 MXU operands with f32 accumulation -> ~1% relative error budget.
    assert jnp.allclose(out, ref_out, atol=5e-2, rtol=5e-2), float(
        jnp.max(jnp.abs(out - ref_out)))
    assert jnp.allclose(state, ref_state, atol=5e-2, rtol=5e-2), float(
        jnp.max(jnp.abs(state - ref_state)))

    print("KERNEL_OK")
</pallas_src>

<mosaic_0001>
module attributes {stable_mosaic.version = 11 : i64} {
  func.func @kernel(%arg0: i32, %arg1: i32, %arg2: memref<1x8x32xbf16, #tpu.memory_space<vmem>>, %arg3: memref<32x512xbf16, #tpu.memory_space<vmem>>, %arg4: memref<128x128xbf16, #tpu.memory_space<vmem>>, %arg5: memref<1x8x128xf32, #tpu.memory_space<vmem>>, %arg6: memref<1x128x128xf32, #tpu.memory_space<vmem>>) attributes {dimension_semantics = [#tpu.dimension_semantics<parallel>, #tpu.dimension_semantics<arbitrary>], iteration_bounds = array<i64: 2, 1>, scalar_prefetch = 0 : i64, scratch_operands = 0 : i64, tpu.core_type = #tpu.core_type<tc>, window_params = [{transform_indices = @transform_0, window_bounds = array<i64: 1, 8, 32>}, {pipeline_mode = #tpu.pipeline_mode<synchronous>, transform_indices = @transform_1, window_bounds = array<i64: 32, 512>}, {pipeline_mode = #tpu.pipeline_mode<synchronous>, transform_indices = @transform_2, window_bounds = array<i64: 128, 128>}, {transform_indices = @transform_3, window_bounds = array<i64: 1, 8, 128>}, {transform_indices = @transform_4, window_bounds = array<i64: 1, 128, 128>}]} {
    %c0_i32 = arith.constant 0 : i32
    %0 = arith.cmpi eq, %arg1, %c0_i32 : i32
    %1 = arith.extui %0 : i1 to i32
    %c0_i32_0 = arith.constant 0 : i32
    %2 = arith.cmpi ne, %1, %c0_i32_0 : i32
    scf.if %2 {
      %cst_29 = arith.constant 0.000000e+00 : f32
      %85 = vector.broadcast %cst_29 : f32 to vector<1x128x128xf32>
      %c0_30 = arith.constant 0 : index
      %c0_31 = arith.constant 0 : index
      %c0_32 = arith.constant 0 : index
      %86 = vector.load %arg6[%c0_30, %c0_31, %c0_32] : memref<1x128x128xf32, #tpu.memory_space<vmem>>, vector<1x128x128xf32>
      tpu.vector_store %arg6[%c0_30, %c0_31, %c0_32], %85 {strides = array<i32>} : memref<1x128x128xf32, #tpu.memory_space<vmem>>, vector<1x128x128xf32>,
    } else {
    }
    %c0 = arith.constant 0 : index
    %c0_1 = arith.constant 0 : index
    %c0_2 = arith.constant 0 : index
    %3 = vector.load %arg2[%c0, %c0_1, %c0_2] : memref<1x8x32xbf16, #tpu.memory_space<vmem>>, vector<1x8x32xbf16>
    %4 = vector.shape_cast %3 : vector<1x8x32xbf16> to vector<8x32xbf16>
    %c0_3 = arith.constant 0 : index
    %c0_4 = arith.constant 0 : index
    %5 = vector.load %arg3[%c0_3, %c0_4] : memref<32x512xbf16, #tpu.memory_space<vmem>>, vector<32x512xbf16>
    %cst = arith.constant dense<0.000000e+00> : vector<8x512xf32>
    %6 = tpu.matmul %4, %5, %cst {dimension_numbers = #tpu.dot_dimension_numbers<[1], [0], [0], [1], [0, 0, 1, 1], [], []>} : vector<8x32xbf16>, vector<32x512xbf16>, vector<8x512xf32> -> vector<8x512xf32>
    %7 = vector.extract_strided_slice %6 {offsets = [0, 0], sizes = [8, 128], strides = [1, 1]} : vector<8x512xf32> to vector<8x128xf32>
    %8 = vector.shape_cast %7 : vector<8x128xf32> to vector<1x8x128xf32>
    %9 = vector.extract_strided_slice %6 {offsets = [0, 128], sizes = [8, 128], strides = [1, 1]} : vector<8x512xf32> to vector<8x128xf32>
    %10 = vector.shape_cast %9 : vector<8x128xf32> to vector<1x8x128xf32>
    %11 = vector.extract_strided_slice %6 {offsets = [0, 256], sizes = [8, 128], strides = [1, 1]} : vector<8x512xf32> to vector<8x128xf32>
    %12 = vector.shape_cast %11 : vector<8x128xf32> to vector<1x8x128xf32>
    %13 = vector.extract_strided_slice %6 {offsets = [0, 384], sizes = [8, 128], strides = [1, 1]} : vector<8x512xf32> to vector<8x128xf32>
    %cst_5 = arith.constant 0.000000e+00 : f32
    %14 = vector.broadcast %cst_5 : f32 to vector<8x128xf32>
    %15 = arith.minimumf %13, %14 : vector<8x128xf32>
    %16 = math.absf %13 : vector<8x128xf32>
    %cst_6 = arith.constant 0.000000e+00 : f32
    %17 = vector.broadcast %cst_6 : f32 to vector<8x128xf32>
    %18 = arith.subf %17, %16 : vector<8x128xf32>
    %19 = math.exp %18 : vector<8x128xf32>
    %cst_7 = arith.constant 1.000000e+00 : f32
    %20 = vector.broadcast %cst_7 : f32 to vector<8x128xf32>
    %21 = arith.addf %20, %19 : vector<8x128xf32>
    %22 = math.log %21 : vector<8x128xf32>
    %23 = arith.subf %15, %22 : vector<8x128xf32>
    %24 = vector.shape_cast %23 : vector<8x128xf32> to vector<1x8x128xf32>
    %25 = tpu.iota {dimensions = array<i32: 0>} : vector<8x128xi32>
    %c8_i32 = arith.constant 8 : i32
    %26 = arith.muli %arg1, %c8_i32 : i32
    %27 = vector.broadcast %26 : i32 to vector<8x128xi32>
    %28 = arith.addi %25, %27 : vector<8x128xi32>
    %29 = tpu.iota {dimensions = array<i32: 1>} : vector<8x128xi32>
    %c8_i32_8 = arith.constant 8 : i32
    %30 = vector.broadcast %c8_i32_8 : i32 to vector<8x128xi32>
    %31 = arith.cmpi slt, %28, %30 : vector<8x128xi32>
    %c16_i32 = arith.constant 16 : i32
    %32 = vector.broadcast %c16_i32 : i32 to vector<8x128xi32>
    %33 = arith.cmpi slt, %29, %32 : vector<8x128xi32>
    %34 = arith.andi %31, %33 : vector<8x128xi1>
    %35 = vector.shape_cast %34 : vector<8x128xi1> to vector<1x8x128xi1>
    %cst_9 = arith.constant 0.000000e+00 : f32
    %36 = vector.broadcast %cst_9 : f32 to vector<1x8x128xf32>
    %37 = arith.select %35, %24, %36 : vector<1x8x128xi1>, vector<1x8x128xf32>
    %38 = tpu.iota {dimensions = array<i32: 0>} : vector<8x8xi32>
    %39 = tpu.iota {dimensions = array<i32: 1>} : vector<8x8xi32>
    %40 = arith.cmpi sle, %39, %38 : vector<8x8xi32>
    %41 = arith.extui %40 : vector<8x8xi1> to vector<8x8xi32>
    %42 = arith.sitofp %41 : vector<8x8xi32> to vector<8x8xf32>
    %43 = vector.shape_cast %42 : vector<8x8xf32> to vector<1x8x8xf32>
    "tpu.trace_start"() <{level = 10 : i32, message = "bts,bsi->bti"}> : () -> ()
    %cst_10 = arith.constant dense<0.000000e+00> : vector<1x8x128xf32>
    %44 = tpu.matmul %43, %37, %cst_10 {dimension_numbers = #tpu.dot_dimension_numbers<[2], [1], [1], [2], [0, 0, 0, 1, 1, 2], [0], [0]>} : vector<1x8x8xf32>, vector<1x8x128xf32>, vector<1x8x128xf32> -> vector<1x8x128xf32>
    "tpu.trace_stop"() : () -> ()
    %45 = math.exp %44 : vector<1x8x128xf32>
    %46 = vector.extract_strided_slice %44 {offsets = [0, 7, 0], sizes = [1, 1, 128], strides = [1, 1, 1]} : vector<1x8x128xf32> to vector<1x1x128xf32>
    %47 = vector.shape_cast %46 : vector<1x1x128xf32> to vector<1x128xf32>
    %48 = math.exp %47 : vector<1x128xf32>
    %49 = arith.mulf %8, %45 : vector<1x8x128xf32>
    %50 = arith.truncf %49 : vector<1x8x128xf32> to vector<1x8x128xbf16>
    %cst_11 = arith.constant 0.000000e+00 : f32
    %51 = vector.broadcast %cst_11 : f32 to vector<1x8x128xf32>
    %52 = arith.subf %51, %44 : vector<1x8x128xf32>
    %53 = math.exp %52 : vector<1x8x128xf32>
    %54 = arith.mulf %10, %53 : vector<1x8x128xf32>
    %55 = arith.truncf %54 : vector<1x8x128xf32> to vector<1x8x128xbf16>
    %56 = vector.shape_cast %47 : vector<1x128xf32> to vector<1x1x128xf32>
    %57 = vector.broadcast %56 : vector<1x1x128xf32> to vector<1x8x128xf32>
    %58 = arith.subf %57, %44 : vector<1x8x128xf32>
    %59 = math.exp %58 : vector<1x8x128xf32>
    %60 = arith.mulf %10, %59 : vector<1x8x128xf32>
    %61 = arith.truncf %60 : vector<1x8x128xf32> to vector<1x8x128xbf16>
    %62 = arith.truncf %12 : vector<1x8x128xf32> to vector<1x8x128xbf16>
    %c0_12 = arith.constant 0 : index
    %c0_13 = arith.constant 0 : index
    %c0_14 = arith.constant 0 : index
    %63 = vector.load %arg6[%c0_12, %c0_13, %c0_14] : memref<1x128x128xf32, #tpu.memory_space<vmem>>, vector<1x128x128xf32>
    "tpu.trace_start"() <{level = 10 : i32, message = "bti,bsi->bts"}> : () -> ()
    %cst_15 = arith.constant dense<0.000000e+00> : vector<1x8x8xf32>
    %64 = tpu.matmul %50, %55, %cst_15 {dimension_numbers = #tpu.dot_dimension_numbers<[2], [2], [1], [1], [0, 0, 0, 1, 1, 1], [0], [0]>} : vector<1x8x128xbf16>, vector<1x8x128xbf16>, vector<1x8x8xf32> -> vector<1x8x8xf32>
    "tpu.trace_stop"() : () -> ()
    %65 = vector.shape_cast %40 : vector<8x8xi1> to vector<1x8x8xi1>
    %cst_16 = arith.constant 0.000000e+00 : f32
    %66 = vector.broadcast %cst_16 : f32 to vector<1x8x8xf32>
    %67 = arith.select %65, %64, %66 : vector<1x8x8xi1>, vector<1x8x8xf32>
    %68 = arith.truncf %67 : vector<1x8x8xf32> to vector<1x8x8xbf16>
    "tpu.trace_start"() <{level = 10 : i32, message = "bts,bsv->btv"}> : () -> ()
    %cst_17 = arith.constant dense<0.000000e+00> : vector<1x8x128xf32>
    %69 = tpu.matmul %68, %62, %cst_17 {dimension_numbers = #tpu.dot_dimension_numbers<[2], [1], [1], [2], [0, 0, 0, 1, 1, 2], [0], [0]>} : vector<1x8x8xbf16>, vector<1x8x128xbf16>, vector<1x8x128xf32> -> vector<1x8x128xf32>
    "tpu.trace_stop"() : () -> ()
    %70 = arith.truncf %63 : vector<1x128x128xf32> to vector<1x128x128xbf16>
    "tpu.trace_start"() <{level = 10 : i32, message = "bti,biv->btv"}> : () -> ()
    %cst_18 = arith.constant dense<0.000000e+00> : vector<1x8x128xf32>
    %71 = tpu.matmul %50, %70, %cst_18 {dimension_numbers = #tpu.dot_dimension_numbers<[2], [1], [1], [2], [0, 0, 0, 1, 1, 2], [0], [0]>} : vector<1x8x128xbf16>, vector<1x128x128xbf16>, vector<1x8x128xf32> -> vector<1x8x128xf32>
    "tpu.trace_stop"() : () -> ()
    %72 = arith.addf %69, %71 : vector<1x8x128xf32>
    %73 = vector.shape_cast %72 : vector<1x8x128xf32> to vector<8x128xf32>
    %74 = arith.truncf %73 : vector<8x128xf32> to vector<8x128xbf16>
    %c0_19 = arith.constant 0 : index
    %c0_20 = arith.constant 0 : index
    %75 = vector.load %arg4[%c0_19, %c0_20] : memref<128x128xbf16, #tpu.memory_space<vmem>>, vector<128x128xbf16>
    %cst_21 = arith.constant dense<0.000000e+00> : vector<8x128xf32>
    %76 = tpu.matmul %74, %75, %cst_21 {dimension_numbers = #tpu.dot_dimension_numbers<[1], [0], [0], [1], [0, 0, 1, 1], [], []>} : vector<8x128xbf16>, vector<128x128xbf16>, vector<8x128xf32> -> vector<8x128xf32>
    %77 = vector.shape_cast %76 : vector<8x128xf32> to vector<1x8x128xf32>
    %c0_22 = arith.constant 0 : index
    %c0_23 = arith.constant 0 : index
    %c0_24 = arith.constant 0 : index
    %78 = vector.load %arg5[%c0_22, %c0_23, %c0_24] : memref<1x8x128xf32, #tpu.memory_space<vmem>>, vector<1x8x128xf32>
    tpu.vector_store %arg5[%c0_22, %c0_23, %c0_24], %77 {strides = array<i32>} : memref<1x8x128xf32, #tpu.memory_space<vmem>>, vector<1x8x128xf32>,
    "tpu.trace_start"() <{level = 10 : i32, message = "bsi,bsv->biv"}> : () -> ()
    %cst_25 = arith.constant dense<0.000000e+00> : vector<1x128x128xf32>
    %79 = tpu.matmul %61, %62, %cst_25 {dimension_numbers = #tpu.dot_dimension_numbers<[1], [1], [2], [2], [0, 0, 0, 2, 1, 2], [0], [0]>} : vector<1x8x128xbf16>, vector<1x8x128xbf16>, vector<1x128x128xf32> -> vector<1x128x128xf32>
    "tpu.trace_stop"() : () -> ()
    %80 = vector.shape_cast %48 : vector<1x128xf32> to vector<1x128x1xf32>
    %81 = vector.broadcast %80 : vector<1x128x1xf32> to vector<1x128x128xf32>
    %82 = arith.mulf %81, %63 : vector<1x128x128xf32>
    %83 = arith.addf %82, %79 : vector<1x128x128xf32>
    %c0_26 = arith.constant 0 : index
    %c0_27 = arith.constant 0 : index
    %c0_28 = arith.constant 0 : index
    %84 = vector.load %arg6[%c0_26, %c0_27, %c0_28] : memref<1x128x128xf32, #tpu.memory_space<vmem>>, vector<1x128x128xf32>
    tpu.vector_store %arg6[%c0_26, %c0_27, %c0_28], %83 {strides = array<i32>} : memref<1x128x128xf32, #tpu.memory_space<vmem>>, vector<1x128x128xf32>,
    return
  }
  func.func @transform_0(%arg0: i32, %arg1: i32) -> (i32, i32, i32) {
    %c0_i32 = arith.constant 0 : i32
    %c0_i32_0 = arith.constant 0 : i32
    return %arg0, %arg1, %c0_i32 : i32, i32, i32
  }
  func.func @transform_1(%arg0: i32, %arg1: i32) -> (i32, i32) {
    %c0_i32 = arith.constant 0 : i32
    %c0_i32_0 = arith.constant 0 : i32
    %c0_i32_1 = arith.constant 0 : i32
    return %c0_i32, %c0_i32_0 : i32, i32
  }
  func.func @transform_2(%arg0: i32, %arg1: i32) -> (i32, i32) {
    %c0_i32 = arith.constant 0 : i32
    %c0_i32_0 = arith.constant 0 : i32
    %c0_i32_1 = arith.constant 0 : i32
    return %c0_i32, %c0_i32_0 : i32, i32
  }
  func.func @transform_3(%arg0: i32, %arg1: i32) -> (i32, i32, i32) {
    %c0_i32 = arith.constant 0 : i32
    %c0_i32_0 = arith.constant 0 : i32
    return %arg0, %arg1, %c0_i32 : i32, i32, i32
  }
  func.func @transform_4(%arg0: i32, %arg1: i32) -> (i32, i32, i32) {
    %c0_i32 = arith.constant 0 : i32
    %c0_i32_0 = arith.constant 0 : i32
    %c0_i32_1 = arith.constant 0 : i32
    return %arg0, %c0_i32, %c0_i32_0 : i32, i32, i32
  }
}

</mosaic_0001>

<bundles_post_ra>
// kernel: base_rnn_forward.1
= control target key start
LH: loop header
LB: loop body
LE: loop exit
PB: predicated region body
PF: predicated region fallthrough
CT: control target
= control target key end

     0   :  { %10 = vsyncpa [#allocation3], 0  ;;  %s1732_s0 = inlined_call_operand.vmem [shape: bf16[2,8,32], index: 0, kind: input, shape index: {}]   ;;  %s1733_s1 = inlined_call_operand.vmem [shape: bf16[32,512], index: 1, kind: input, shape index: {}]   ;;  %s1734_s2 = inlined_call_operand.vmem [shape: bf16[128,128], index: 2, kind: input, shape index: {}]   ;;  %s1735_s3 = inlined_call_operand.hbm [shape: f32[2,8,128], index: 3, kind: output, shape index: {0}]   ;;  %s1736_s4 = inlined_call_operand.vmem [shape: f32[2,128,128], index: 4, kind: output, shape index: {1}]  }
   0x1   :  { %12 = vsyncpa [#allocation3 + $0x1], 0  ;;  %s1482_s15 = smov 0   ;;  %s1484_s16 = smov 0  }
   0x2   :  { %s1486_s17 = smov 0   ;;  %s1488_s18 = smov 0  }
   0x3   :  { %s1490_s19 = smov 0   ;;  %s1492_s20 = smov 0  }
   0x4 LB: > { %s1133_s21 = sadd.s32 4294967295, %s1450_s20   ;;  %s1134_s22 = sadd.s32 4294967294, %s1450_s20   ;;  %s1450_s20 = sphi %s1492_s20, %s18_s20   ;;  %s1446_s19 = sphi %s1490_s19, %s1743_s19   ;;  %s1442_s18 = sphi %s1488_s18, %s1742_s18   ;;  %s1438_s17 = sphi %s1486_s17, %s1741_s17   ;;  %s1434_s16 = sphi %s1484_s16, %s1740_s16   ;;  %s1430_s15 = sphi %s1482_s15, %s1739_s15  }
   0x5   : > { %s30_s23 = sadd.s32 1, %s1446_s19  ;;  %s109_s24 = sadd.s32 1, %s1438_s17 }
   0x6   : > { %p32_p0 = scmp.ge.s32.totalorder %s30_s23, 2  ;;  %p119_p1 = scmp.ne.s32.totalorder %s1438_s17, %s1434_s16 }
   0x7   : > { %p120_p2 = scmp.eq.s32.totalorder %s1133_s21, 1  ;;  %p125_p3 = scmp.ne.s32.totalorder %s1434_s16, %s1430_s15 }
   0x8   : > { %s1745_s23 = smov (%p32_p0, %s30_s23), 0  ;;  %p126_p5 = scmp.eq.s32.totalorder %s1134_s22, 1 }
   0x9   : > { %p1522_p4 = por %p120_p2, %p119_p1  ;;  %s104_s26 = ssub.s32 %s1446_s19, %s1745_s23 }
   0xa   : > { %p1137_p6 = scmp.ge.s32.totalorder %s1450_s20, 1  ;;  %p107_p7 = scmp.eq.s32.totalorder %s104_s26, 0 }
   0xb   : > { %p1529_p8 = por %p126_p5, %p125_p3  ;;  %p186_p9 = scmp.lt.s32.totalorder %s1450_s20, 3 }
   0xc   : > { %s1535_s28 = scalar_select %p107_p7, %s1438_s17, %s109_s24  }
   0xd   : > { %p187_p10 = pnand %p1137_p6, %p186_p9 }
   0xe   : > { %p219_p11 = scmp.lt.s32.totalorder (!%p187_p10), %s1442_s18, 1 }
   0xf   : > { %190 = sbr.rel (%p187_p10) target bundleno = 1097 (0x449), region = 32 }
  0x14   : > { %v1344_v0 = vld [vmem:[%s1733_s1 + $0x24] ss:$16 sps:$4 sm:$0xff]   ;;  %v1346_v1 = vld [vmem:[%s1733_s1 + $0x20] ss:$16 sps:$4 sm:$0xff]   ;;  %v1452_v2 = vmov 0   ;;  %s1548_s9 = scalar_select %p219_p11, %s1442_s18, 1  ;;  %v396_v24 = vlaneseq }
  0x15   : > { %337 = vmatprep.mubr.bf16.mxu1 %v1452_v2  ;;  %317 = vmatprep.subr.bf16.mxu1 %v1344_v0  ;;  %v1347_v3 = vld [vmem:[%s1733_s1 + $0x4] ss:$16 sps:$4 sm:$0xff]   ;;  %v1349_v4 = vld [vmem:[%s1733_s1] ss:$16 sps:$4 sm:$0xff]   ;;  %vm301_vm0 = vcmask 261120   ;;  %v1453_v10 = vmov 0.0  }
  0x16   : > { %318 = vmatpush1.bf16.msra.mxu1 %v1346_v1  ;;  %s1139_s12 = sshll.u32 %s1548_s9, 2  ;;  %v1352_v5 = vld [vmem:[%s1733_s1 + $0x2c] ss:$16 sps:$4 sm:$0xff]   ;;  %v1350_v6 = vld [vmem:[%s1733_s1 + $0x28] ss:$16 sps:$4 sm:$0xff]   ;;  %1210 = vmatprep.subr.mxu0 %v1453_v10  ;;  %vm1454_vm1 = vmmov 0  }
  0x17   : > { %319 = vmatprep.subr.bf16.mxu1 %v1347_v3  ;;  %s225_s24 = scalar_lea.vmem %s1732_s0, %s1139_s12  ;;  %v1355_v8 = vld [vmem:[%s1733_s1 + $0xc] ss:$16 sps:$4 sm:$0xff]   ;;  %v1353_v9 = vld [vmem:[%s1733_s1 + $0x8] ss:$16 sps:$4 sm:$0xff]   ;;  %1212 = vmatprep.mubr.msk.f32.mxu0 %vm1454_vm1, %v1453_v10  ;;  %v1579_v25 = vand.u32 127, %v396_v24  ;;  %v1581_v26 = vshrl.u32 %v396_v24, 7 }
  0x18   : > { %v252_v7 = vld [vmem:[%s225_s24] sm:$0xf]  ;;  %vm410_vm4 = vcmask 64512   ;;  %v1455_v32 = vmov 0.0|0.0   ;;  %vm612_vm5 = vcmask 1043456   ;;  %s1176_s10 = sshll.u32 %s1548_s9, 7 }
  0x19   : > { %vm407_vm2 = vcmp.le.s32.totalorder %v1579_v25, %v1581_v26  ;;  %vm404_vm3 = vcmp.lt.s32.totalorder %v1579_v25, 16  ;;  %v495_v34 = vsub.s32 7, %v1581_v26  ;;  %s1662_s13 = scalar_lea.vmem %s1736_s4, %s1176_s10  ;;  %s209_s9 = sand.u32 1, %s1434_s16  }
  0x1a   : > { %320 = vmatpush1.bf16.msra.mxu1 %v1349_v4  ;;  %v1152_v31 = vsel %vm407_vm2, 1.0, %v1453_v10  ;;  %s1138_s14 = sshll.u32 %s209_s9, 3  ;;  %s1173_s24 = sshll.u32 %s1442_s18, 7 }
  0x1b   : > { %358 = vmatprep.subr.bf16.mxu1 %v1352_v5  ;;  %s211_s21 = scalar_lea.vmem [#allocation2], %s1138_s14  ;;  %s1688_s30 = scalar_lea.hbm %s1735_s3, %s1173_s24 }
  0x1c   : > { %s1034_s22 = sshll.u32 %s211_s21, 4  ;;  %s1015_s5 = scalar_lea.sflag [#allocation3], %s209_s9  ;;  %s1683_s22 = int_to_ptr.vmem [resolvable:$true] %s1034_s22 }
  0x1d   : > { %1150 = vmatmul.mubr.msk.bf16.vlgmr.msra.gmra.mxu1 %vm301_vm0, %v252_v7  ;;  %s1374_s6 = scalar_lea.vmem %s1683_s22, 128  ;;  %s1456_s18 = smov [#allocation2]  }
  0x1e   : > { %359 = vmatpush1.bf16.msra.mxu1 %v1350_v6  ;;  %378 = vmatprep.mubr.bf16.mxu1 %v1452_v2  ;;  %v1356_v6 = vld [vmem:[%s1734_s2 + $0x38] sm:$0xff]   ;;  %p1375_p12 = scmp.ne.s32.totalorder %s1683_s22, %s1374_s6  ;;  %s1378_s7 = sshll.u32 %s1456_s18, 4  ;;  %s1379_s7 = int_to_ptr.vmem [resolvable:$false] %s1378_s7 }
  0x1f   : > { %360 = vmatprep.subr.bf16.mxu1 %v1355_v8  ;;  %v1357_v8 = vld [vmem:[%s1734_s2 + $0x30] sm:$0xff]   ;;  %s1380_s8 = scalar_lea.vmem %s1379_s7, 256  ;;  %p1381_p1 = scmp.lt.s32.totalorder %s1683_s22, %s1379_s7 }
  0x20   : > { %p1376_p13 = pnand %p1375_p12, %p1522_p4  ;;  %p1382_p2 = scmp.lt.s32.totalorder %s1380_s8, %s1374_s6 }
  0x22   : > { %361 = vmatpush1.bf16.msra.mxu1 %v1353_v9  ;;  %p1377_p0 = pneg %p1376_p13  ;;  %p1383_p3 = por %p1382_p2, %p1381_p1 }
  0x23   : > { %1215 = vmatprep.subr.bf16.mxu1 %v1453_v10 }
  0x24   : > { %p1384_p5 = pnand %p1383_p3, %p1377_p0 }
  0x25   : > { %1151 = vmatmul.mubr.msk.bf16.vlgmr.msra.gmra.mxu1 %vm301_vm0, %v252_v7 }
  0x26   : > { %1217 = vmatprep.mubr.msk.bf16.mxu1 %vm1454_vm1, %v1453_v10 }
  0xdd   : > { %v1575_v11 = vpop.f32.mrf.mxu1 }
  0xdf   : > { %v1577_v12 = vpop.f32.mrf.mxu1 }
  0xe1   : > { %v343_v13 = vpop.f32.mrf.mxu1 }
  0xe2   : > { %v1360_v13 = vld [vmem:[%s1734_s2 + $0x18] sm:$0xff]  }
  0xe3   : > { %v344_v14 = vpop.f32.mrf.mxu1 }
  0xe4   : > { %v1361_v14 = vld [vmem:[%s1734_s2 + $0x10] sm:$0xff]  }
  0xe5   : > { %v380_v15 = vpop.f32.mrf.mxu1 }
  0xe6   : > { %v502_v33 = vpack.c.bf16 %v380_v15, %v380_v15  ;;  %v1362_v15 = vld [vmem:[%s1734_s2 + $0x8] sm:$0xff]  }
  0xe7   : > { %v382_v16 = vpop.f32.mrf.mxu1 }
  0xe8   : > { %v388_v17 = vand.u32 2147483647, %v382_v16  ;;  %v387_v28 = vmin.f32 %v382_v16, 0.0  ;;  %v614_v50 = vsel %vm612_vm5, %v502_v33, 0 }
  0xe9   : > { %v384_v18 = vpop.f32.mrf.mxu1 }
  0xea   : > { %v389_v19 = vsub.f32 0.0, %v388_v17 }
  0xeb   : > { %v385_v20 = vpop.f32.mrf.mxu1 }
  0xec   : > { %v390_v21 = vmul.f32 1.442695, %v389_v19  ;;  %v1363_v20 = vld [vmem:[%s1734_s2] sm:$0xff]  }
  0xee   : > { %1364 = vpow2.f32 %v390_v21 }
  0xfb   : > { %v1365_v22 = vpop.eup %1364 }
  0xfc   : > { %v392_v23 = vadd.f32 1.0, %v1365_v22 }
  0xfe   : > { %1366 = vlog2.f32 %v392_v23 }
 0x10b   : > { %v1367_v27 = vpop.eup %1366 }
 0x10c   : > { %v394_v29 = vmul.f32 0.6931472, %v1367_v27 }
 0x10e   : > { %v395_v30 = vsub.f32 %v387_v28, %v394_v29 }
 0x110   : > { %1211 = vmatpush3.msk.msra.mxu0 %vm404_vm3, %v395_v30 }
 0x111   : > { %1213 = vmatmul.mubr.msk.f32.vlgmr.msra.gmra.mxu0 %vm410_vm4, %v1152_v31  ;;  %1221 = vmatprep.subr.bf16.mxu0 %v1453_v10 }
 0x112   : > { %1222 = vmatpush3.bf16.msra.mxu0 %v1455_v32  ;;  %1237 = vmatprep.mubr.msk.bf16.mxu0 %vm1454_vm1, %v1453_v10 }
 0x113   : > { %1223 = vmatprep.subr.bf16.mxu0 %v1453_v10 }
 0x116   : > { %1224 = vmatpush3.bf16.msra.mxu0 %v1455_v32 }
 0x117   : > { %1225 = vmatprep.subr.bf16.mxu0 %v1453_v10 }
 0x11a   : > { %1226 = vmatpush3.bf16.msra.mxu0 %v1455_v32 }
 0x11b   : > { %1227 = vmatprep.subr.bf16.mxu0 %v1453_v10 }
 0x11e   : > { %1228 = vmatpush3.bf16.msra.mxu0 %v1455_v32 }
 0x11f   : > { %1229 = vmatprep.subr.bf16.mxu0 %v1453_v10 }
 0x122   : > { %1230 = vmatpush3.bf16.msra.mxu0 %v1455_v32 }
 0x123   : > { %1231 = vmatprep.subr.bf16.mxu0 %v1453_v10 }
 0x126   : > { %1232 = vmatpush3.bf16.msra.mxu0 %v1455_v32 }
 0x127   : > { %1233 = vmatprep.subr.bf16.mxu0 %v1453_v10 }
 0x12a   : > { %1234 = vmatpush3.bf16.msra.mxu0 %v1455_v32 }
 0x12b   : > { %1235 = vmatprep.subr.bf16.mxu0 %v1453_v10 }
 0x12e   : > { %1236 = vmatpush3.bf16.msra.mxu0 %v1455_v32 }
 0x12f   : > { %1285 = vmatprep.subr.msk.bf16.mxu0 %vm612_vm5, %v502_v33 }
 0x1d1   : > { %v480_v35 = vpop.f32.mrf.mxu0 }
 0x1d2   : > { %v484_v36 = vmul.f32 1.442695, %v480_v35  ;;  %v488_v37 = vsub.f32 0.0, %v480_v35  ;;  %v496_v38 = vrot.slane %v480_v35, %v495_v34 }
 0x1d3   : > { %v1214_v39 = vpop.f32.mrf.mxu0 }
 0x1d4   : > { %1368 = vpow2.f32 %v484_v36  ;;  %v489_v40 = vmul.f32 1.442695, %v488_v37  ;;  %v497_v41 = vsub.f32 %v496_v38, %v480_v35 }
 0x1d6   : > { %1370 = vpow2.f32 %v489_v40  ;;  %v498_v42 = vmul.f32 1.442695, %v497_v41 }
 0x1d8   : > { %1372 = vpow2.f32 %v498_v42 }
 0x1e1   : > { %v1369_v43 = vpop.eup %1368 }
 0x1e2   : > { %v902_v44 = vrot.slane %v1369_v43, %v495_v34  ;;  %v486_v45 = vmul.f32 %v1369_v43, %v1575_v11  ;;  %v1358_v11 = vld [vmem:[%s1734_s2 + $0x28] sm:$0xff]  }
 0x1e3   : > { %v1371_v46 = vpop.eup %1370 }
 0x1e4   : > { %908 = vbcast.lane.b32.xlu1 %v902_v44, 264  ;;  %v487_v47 = vpack.c.bf16 %v486_v45, %v486_v45  ;;  %v491_v48 = vmul.f32 %v1371_v46, %v1577_v12 }
 0x1e5   : > { %v1373_v49 = vpop.eup %1372 }
 0x1e6   : > { %1238 = vmatmul.mubr.bf16.vlgmr.msra.gmra.mxu0 %v487_v47  ;;  %v492_v51 = vpack.c.bf16 %v491_v48, %v491_v48  ;;  %v500_v52 = vmul.f32 %v1373_v49, %v1577_v12  ;;  %v1359_v12 = vld [vmem:[%s1734_s2 + $0x20] sm:$0xff]  }
 0x1e7   : > { %1268 = vmatpush3.bf16.msra.mxu0 %v614_v50 }
 0x1e8   : > { %1216 = vmatpush3.bf16.xpose.msra.mxu1 %v492_v51  ;;  %912 = vbcast.lane.b32.xlu1 %v902_v44, 272  ;;  %v501_v53 = vpack.c.bf16 %v500_v52, %v500_v52 }
 0x1e9   : > { %1241 = vmatprep.subr.bf16.mxu1 %v1453_v10 }
 0x1ea   : > { %762 = vxpose.xlu0.c.b16.start.end [1/1] (short) %v501_v53, 128 }
 0x1ec   : > { %916 = vbcast.lane.b32.xlu1 %v902_v44, 280 }
 0x1ef   : > { %1218 = vmatmul.mubr.bf16.vlgmr.msra.gmra.mxu1 %v487_v47 }
 0x1f0   : > { %920 = vbcast.lane.b32.xlu1 %v902_v44, 288  ;;  %1242 = vmatpush3.bf16.msra.mxu1 %v614_v50 }
 0x1f1   : > { %1243 = vmatprep.mubr.msk.bf16.mxu1 %vm1454_vm1, %v1453_v10  ;;  %1247 = vmatprep.subr.bf16.mxu1 %v1453_v10 }
 0x1f4   : > { %924 = vbcast.lane.b32.xlu1 %v902_v44, 296 }
 0x1f8   : > { %928 = vbcast.lane.b32.xlu1 %v902_v44, 304 }
 0x1fc   : > { %932 = vbcast.lane.b32.xlu1 %v902_v44, 312 }
 0x200   : > { %936 = vbcast.lane.b32.xlu1 %v902_v44, 320 }
 0x204   : > { %940 = vbcast.lane.b32.xlu1 %v902_v44, 328 }
 0x208   : > { %944 = vbcast.lane.b32.xlu1 %v902_v44, 336 }
 0x20c   : > { %948 = vbcast.lane.b32.xlu1 %v902_v44, 344 }
 0x20f   : > { %904 = vbcast.lane.b32.xlu0 %v902_v44, 256 }
 0x210   : > { %956 = vbcast.lane.b32.xlu1 %v902_v44, 360 }
 0x213   : > { %952 = vbcast.lane.b32.xlu0 %v902_v44, 352 }
 0x214   : > { %964 = vbcast.lane.b32.xlu1 %v902_v44, 376 }
 0x217   : > { %960 = vbcast.lane.b32.xlu0 %v902_v44, 368 }
 0x24c   : > { %v770_v54 = vpop.trf.xlu0 }
 0x24d   : > { %1269 = vmatprep.mubr.msk.bf16.mxu0 %vm410_vm4, %v770_v54 }
 0x250   : > { %v771_v55 = vpop.trf.xlu0 }
 0x251   : > { %1270 = vmatmul.mubr.msk.bf16.vlgmr.msra.gmra.mxu0 %vm410_vm4, %v771_v55 }
 0x254   : > { %v772_v56 = vpop.trf.xlu0 }
 0x255   : > { %1273 = vmatprep.mubr.msk.bf16.mxu0 %vm410_vm4, %v772_v56 }
 0x256   : > { %v909_v16 = vpop.permute.xlu1 %908 }
 0x257   : > { %v967_v34 = vmul.f32 0.0, %v909_v16 }
 0x258   : > { %v773_v57 = vpop.trf.xlu0 }
 0x259   : > { %1274 = vmatmul.mubr.msk.bf16.gmra.mxu0 %vm410_vm4, %v773_v57 }
 0x25a   : > { %v913_v17 = vpop.permute.xlu1 %912 }
 0x25b   : > { %v968_v26 = vmul.f32 0.0, %v913_v17 }
 0x25c   : > { %v774_v58 = vpop.trf.xlu0 }
 0x25d   : > { %1277 = vmatprep.mubr.msk.bf16.mxu0 %vm410_vm4, %v774_v58 }
 0x25e   : > { %v917_v18 = vpop.permute.xlu1 %916 }
 0x25f   : > { %v969_v31 = vmul.f32 0.0, %v917_v18 }
 0x260   : > { %v775_v59 = vpop.trf.xlu0 }
 0x261   : > { %1278 = vmatmul.mubr.msk.bf16.gmra.mxu0 %vm410_vm4, %v775_v59 }
 0x262   : > { %v921_v19 = vpop.permute.xlu1 %920 }
 0x263   : > { %v970_v41 = vmul.f32 0.0, %v921_v19 }
 0x264   : > { %v776_v60 = vpop.trf.xlu0 }
 0x265   : > { %1281 = vmatprep.mubr.msk.bf16.mxu0 %vm410_vm4, %v776_v60 }
 0x266   : > { %v925_v21 = vpop.permute.xlu1 %924 }
 0x267   : > { %v971_v48 = vmul.f32 0.0, %v925_v21 }
 0x268   : > { %v777_v61 = vpop.trf.xlu0 }
 0x269   : > { %1282 = vmatmul.mubr.msk.bf16.gmra.mxu0 %vm410_vm4, %v777_v61 }
 0x26a   : > { %v929_v22 = vpop.permute.xlu1 %928 }
 0x26b   : > { %v972_v38 = vmul.f32 0.0, %v929_v22 }
 0x26e   : > { %v933_v23 = vpop.permute.xlu1 %932 }
 0x26f   : > { %v973_v44 = vmul.f32 0.0, %v933_v23 }
 0x272   : > { %v937_v24 = vpop.permute.xlu1 %936 }
 0x273   : > { %v974_v55 = vmul.f32 0.0, %v937_v24 }
 0x281   : > { %v905_v25 = vpop.permute.xlu0 %904 }
 0x282   : > { %v966_v28 = vmul.f32 0.0, %v905_v25 }
 0x285   : > { %v953_v50 = vpop.permute.xlu0 %952 }
 0x289   : > { %v961_v61 = vpop.permute.xlu0 %960 }
 0x2a6   : > { %v1619_v62 = vpop.f32.mrf.mxu0 }
 0x2a8   : > { %v1239_v63 = vpop.f32.mrf.mxu0 }
 0x2aa   : > { %v606_v0 = vpop.f32.mrf.mxu0 }
 0x2ac   : > { %v1240_v1 = vpop.f32.mrf.mxu0 }
 0x2af   : > { %v553_v2 = vpop.f32.mrf.mxu1 }
 0x2b0   : > { %v559_v3 = vsel %vm407_vm2, %v553_v2, 0.0 }
 0x2b1   : > { %v560_v4 = vpack.c.bf16 %v559_v3, %v559_v3  ;;  %v1219_v5 = vpop.f32.mrf.mxu1  ;;  %v980_v3 = vmul.f32 0.0, %v961_v61 }
 0x2b3   : > { %v556_v7 = vpop.f32.mrf.mxu1  ;;  %1244 = vmatmul.mubr.msk.bf16.vlgmr.msra.gmra.mxu1 %vm410_vm4, %v560_v4 }
 0x2b4   : > { %1248 = vmatpush3.bf16.msra.mxu1 %v1356_v6  ;;  %1263 = vmatprep.mubr.msk.bf16.mxu1 %vm1454_vm1, %v1453_v10  ;;  %v978_v7 = vmul.f32 0.0, %v953_v50 }
 0x2b5   : > { %v1220_v9 = vpop.f32.mrf.mxu1  ;;  %1249 = vmatprep.subr.bf16.mxu1 %v1453_v10 }
 0x2b8   : > { %1250 = vmatpush3.bf16.msra.mxu1 %v1357_v8 }
 0x2b9   : > { %1251 = vmatprep.subr.bf16.mxu1 %v1453_v10 }
 0x2bc   : > { %1252 = vmatpush3.bf16.msra.mxu1 %v1358_v11 }
 0x2bd   : > { %1253 = vmatprep.subr.bf16.mxu1 %v1453_v10 }
 0x2c0   : > { %1254 = vmatpush3.bf16.msra.mxu1 %v1359_v12 }
 0x2c1   : > { %1255 = vmatprep.subr.bf16.mxu1 %v1453_v10 }
 0x2c4   : > { %1256 = vmatpush3.bf16.msra.mxu1 %v1360_v13 }
 0x2c5   : > { %1257 = vmatprep.subr.bf16.mxu1 %v1453_v10 }
 0x2c8   : > { %1258 = vmatpush3.bf16.msra.mxu1 %v1361_v14 }
 0x2c9   : > { %1259 = vmatprep.subr.bf16.mxu1 %v1453_v10 }
 0x2cc   : > { %1260 = vmatpush3.bf16.msra.mxu1 %v1362_v15 }
 0x2cd   : > { %1261 = vmatprep.subr.bf16.mxu1 %v1453_v10  ;;  %v941_v10 = vpop.permute.xlu1 %940 }
 0x2ce   : > { %v975_v0 = vmul.f32 0.0, %v941_v10 }
 0x2d0   : > { %1262 = vmatpush3.bf16.msra.mxu1 %v1363_v20 }
 0x2d1   : > { %v945_v36 = vpop.permute.xlu1 %944 }
 0x2d2   : > { %v976_v52 = vmul.f32 0.0, %v945_v36 }
 0x2d5   : > { %v949_v46 = vpop.permute.xlu1 %948 }
 0x2d6   : > { %v977_v59 = vmul.f32 0.0, %v949_v46 }
 0x2d9   : > { %v957_v57 = vpop.permute.xlu1 %956 }
 0x2da   : > { %v979_v14 = vmul.f32 0.0, %v957_v57 }
 0x2dd   : > { %v965_v5 = vpop.permute.xlu1 %964 }
 0x2de   : > { %v981_v11 = vmul.f32 0.0, %v965_v5 }
 0x311   : > { %v1271_v27 = vpop.f32.mrf.mxu0 }
 0x312   : > { %v984_v29 = vadd.f32 %v1271_v27, %v968_v26 }
 0x313   : > { %v836_v30 = vpop.f32.mrf.mxu0 }
 0x314   : > { %1000 = vst [vmem:[%s1662_s13 + $0x10] sm:$0xff] %v984_v29  ;;  %v982_v32 = vadd.f32 %v966_v28, %v836_v30 }
 0x315   : > { %v1272_v33 = vpop.f32.mrf.mxu0 }
 0x316   : > { %998 = vst [vmem:[%s1662_s13] sm:$0xff] %v982_v32  ;;  %v985_v35 = vadd.f32 %v1272_v33, %v969_v31 }
 0x317   : > { %v839_v37 = vpop.f32.mrf.mxu0 }
 0x318   : > { %1001 = vst [vmem:[%s1662_s13 + $0x18] sm:$0xff] %v985_v35  ;;  %v983_v39 = vadd.f32 %v967_v34, %v839_v37 }
 0x319   : > { %v1275_v40 = vpop.f32.mrf.mxu0 }
 0x31a   : > { %999 = vst [vmem:[%s1662_s13 + $0x8] sm:$0xff] %v983_v39  ;;  %v988_v42 = vadd.f32 %v1275_v40, %v972_v38 }
 0x31b   : > { %v852_v43 = vpop.f32.mrf.mxu0 }
 0x31c   : > { %1004 = vst [vmem:[%s1662_s13 + $0x30] sm:$0xff] %v988_v42  ;;  %v986_v45 = vadd.f32 %v970_v41, %v852_v43 }
 0x31d   : > { %v1276_v47 = vpop.f32.mrf.mxu0 }
 0x31e   : > { %1002 = vst [vmem:[%s1662_s13 + $0x20] sm:$0xff] %v986_v45  ;;  %v989_v49 = vadd.f32 %v1276_v47, %v973_v44 }
 0x31f   : > { %v855_v51 = vpop.f32.mrf.mxu0 }
 0x320   : > { %1005 = vst [vmem:[%s1662_s13 + $0x38] sm:$0xff] %v989_v49  ;;  %v987_v53 = vadd.f32 %v971_v48, %v855_v51 }
 0x321   : > { %v1279_v54 = vpop.f32.mrf.mxu0 }
 0x322   : > { %1003 = vst [vmem:[%s1662_s13 + $0x28] sm:$0xff] %v987_v53  ;;  %v992_v56 = vadd.f32 %v1279_v54, %v976_v52 }
 0x323   : > { %v868_v58 = vpop.f32.mrf.mxu0 }
 0x324   : > { %1008 = vst [vmem:[%s1662_s13 + $0x50] sm:$0xff] %v992_v56  ;;  %v990_v60 = vadd.f32 %v974_v55, %v868_v58 }
 0x325   : > { %v1280_v63 = vpop.f32.mrf.mxu0 }
 0x326   : > { %1006 = vst [vmem:[%s1662_s13 + $0x40] sm:$0xff] %v990_v60  ;;  %v993_v1 = vadd.f32 %v1280_v63, %v977_v59 }
 0x327   : > { %v871_v2 = vpop.f32.mrf.mxu0 }
 0x328   : > { %1009 = vst [vmem:[%s1662_s13 + $0x58] sm:$0xff] %v993_v1  ;;  %v991_v4 = vadd.f32 %v975_v0, %v871_v2 }
 0x329   : > { %v1283_v6 = vpop.f32.mrf.mxu0 }
 0x32a   : > { %1007 = vst [vmem:[%s1662_s13 + $0x48] sm:$0xff] %v991_v4  ;;  %v996_v8 = vadd.f32 %v1283_v6, %v980_v3 }
 0x32b   : > { %v884_v9 = vpop.f32.mrf.mxu0 }
 0x32c   : > { %1012 = vst [vmem:[%s1662_s13 + $0x70] sm:$0xff] %v996_v8  ;;  %v994_v12 = vadd.f32 %v978_v7, %v884_v9 }
 0x32d   : > { %v1284_v13 = vpop.f32.mrf.mxu0 }
 0x32e   : > { %1010 = vst [vmem:[%s1662_s13 + $0x60] sm:$0xff] %v994_v12  ;;  %v997_v15 = vadd.f32 %v1284_v13, %v981_v11 }
 0x32f   : > { %v887_v16 = vpop.f32.mrf.mxu0 }
 0x330   : > { %1013 = vst [vmem:[%s1662_s13 + $0x78] sm:$0xff] %v997_v15  ;;  %v995_v17 = vadd.f32 %v979_v14, %v887_v16 }
 0x332   : > { %1011 = vst [vmem:[%s1662_s13 + $0x68] sm:$0xff] %v995_v17 }
 0x373   : > { %v650_v18 = vpop.f32.mrf.mxu1 }
 0x374   : > { %v651_v19 = vadd.f32 %v650_v18, %v1619_v62 }
 0x375   : > { %v1245_v20 = vpop.f32.mrf.mxu1 }
 0x376   : > { %v656_v21 = vpack.c.bf16 %v651_v19, %v651_v19 }
 0x377   : > { %v653_v22 = vpop.f32.mrf.mxu1 }
 0x378   : > { %1264 = vmatmul.mubr.bf16.vlgmr.msra.gmra.mxu1 %v656_v21 }
 0x379   : > { %v1246_v23 = vpop.f32.mrf.mxu1 }
 0x438   : > { %v755_v62 = vpop.f32.mrf.mxu1 }
 0x439   : > { %761 = vst [vmem:[%s211_s21] sm:$0xff] %v755_v62 }
 0x43a   : > { %v1265_v24 = vpop.f32.mrf.mxu1 }
 0x43b   : > { %1387 = shalt.err (!%p1384_p5)
}
 0x43c   : > { %s1388_s10 = scalar_lea.hbm %s1688_s30, 128  ;;  %s1392_s13 = scalar_lea.hbm %s1735_s3, 256 }
 0x43d   : > { %p1389_p6 = scmp.ne.s32.totalorder %s1688_s30, %s1388_s10  ;;  %p1393_p10 = scmp.lt.s32.totalorder %s1688_s30, %s1735_s3 }
 0x43e   : > { %p1394_p11 = scmp.lt.s32.totalorder %s1392_s13, %s1388_s10 }
 0x43f   : > { %p1390_p7 = pnand %p1389_p6, %p1522_p4 }
 0x440   : > { %p1395_p12 = por %p1394_p11, %p1393_p10 }
 0x441   : > { %p1391_p9 = pneg %p1390_p7 }
 0x443   : > { %p1396_p13 = pnand %p1395_p12, %p1391_p9 }
 0x445   : > { %1399 = shalt.err (!%p1396_p13)
}
 0x446   : > { %1286 = dma.vmem_to_hbm [thread:$0]  (%p1522_p4), %s1683_s22, 128, %s1688_s30, %s1015_s5   ;;  %v758_v25 = vpop.f32.mrf.mxu1 }
 0x448   : > { %v1266_v26 = vpop.f32.mrf.mxu1 }
 0x449 PF: > { %p1292_p0 = scmp.ge.s32.totalorder %s1450_s20, 2  ;;  %s1049_s21 = sand.u32 1, %s1430_s15  }
 0x44a   : > { %s1050_s24 = scalar_lea.sflag [#allocation3], %s1049_s21 }
 0x44b   : > { %p1289_p1 = pnand %p1292_p0, %p1529_p8 }
 0x44d   : > { %p1290_p2 = pneg %p1289_p1 }
 0x44f   : > { %1425 = dma.done.wait (%p1290_p2), %s1050_s24, 128  }
 0x450   : > { %1427 = vsyncadd (%p1290_p2), %s1050_s24, 4294967168  ;;  %s18_s20 = sadd.s32 1, %s1450_s20   ;;  %s1739_s15 = smov %s1434_s16 }
 0x451   : > { %p15_p3 = scmp.ge.s32.totalorder %s18_s20, 4   ;;  %s1740_s16 = smov %s1438_s17 }
 0x452   : > { %s1741_s17 = smov %s1535_s28  ;;  %s1742_s18 = smov %s1446_s19 }
 0x453   : > { %s1743_s19 = smov %s1745_s23  ;;  %17 = sbr.rel (!%p15_p3) target bundleno = 4 (0x4), region = 83 }
 0x458   :  { %1063 = vsyncpa [#allocation3], 1 }
 0x459   :  { %1065 = vsyncpa [#allocation3 + $0x1], 1 }

</bundles_post_ra>
